<compile_context>
chip_gen: v6e
topology: v6e:2x2x1
jax: 0.10.0
libtpu: 0.0.40
codegen_flags: <defaults>
</compile_context>

<pallas_src>
import jax
import jax.numpy as jnp
from jax.experimental import pallas as pl
from jax.experimental.pallas import tpu as pltpu


def _round_up(n, m):
    return ((n + m - 1) // m) * m


def _mlp_kernel(x_ref, w0_ref, b0_ref, w1_ref, b1_ref, w2_ref, b2_ref, o_ref):
    """One row-tile of the 3-layer MLP; output stored lane-dense as (1, TM)."""
    x = x_ref[...]                                                       # (TM, D_in)
    h0 = jnp.dot(x, w0_ref[...], preferred_element_type=jnp.float32)    # (TM, H0) f32 acc
    h0 = jnp.maximum(h0 + b0_ref[...], 0.0)                             # bias+ReLU in f32
    h1 = jnp.dot(h0.astype(w1_ref.dtype), w1_ref[...],
                 preferred_element_type=jnp.float32)                    # (TM, H1)
    h1 = jnp.maximum(h1 + b1_ref[...], 0.0)
    out = jnp.dot(h1.astype(w2_ref.dtype), w2_ref[...],
                  preferred_element_type=jnp.float32)                   # (TM, 1)
    out = out + b2_ref[...]                                             # (TM, 1)
    # Lane-dense store: (TM, 1) -> (1, TM); cross-lane move runs on the XLU.
    o_ref[...] = out.reshape(1, out.shape[0]).astype(o_ref.dtype)


def qnetwork_forward(x, params, *, row_tile=None, compute_dtype=jnp.bfloat16):
    """x: (B, S, dim_in) -> (B, S) float32, matching QNetwork.forward."""
    w0, b0, w1, b1, w2, b2 = params
    B, S, D = x.shape
    N = B * S
    H0, H1, DO = w0.shape[1], w1.shape[1], w2.shape[1]
    assert DO == 1, "QNetwork squeezes a dim_out=1 head via .view(B, S)"

    bytes_per_elem = jnp.dtype(compute_dtype).itemsize

    if row_tile is None:
        # Largest tile that keeps the double-buffered x tile comfortably inside
        # the smallest (v7x, 64 MiB) VMEM, capped at 2048 rows and at the padded
        # row count; always a multiple of 128 so the MXU height is filled.
        x_tile_budget = 16 * 1024 * 1024
        max_rows_by_vmem = max(128, x_tile_budget // (2 * D * bytes_per_elem))
        row_tile = min(2048, max_rows_by_vmem, _round_up(N, 128))
        row_tile = _round_up(row_tile, 128)
    row_tile = max(8, _round_up(int(row_tile), 8))

    num_tiles = pl.cdiv(N, row_tile)
    N_pad = num_tiles * row_tile

    xf = x.reshape(N, D).astype(compute_dtype)
    if N_pad != N:
        xf = jnp.pad(xf, ((0, N_pad - N), (0, 0)))

    # Matmul inputs in compute dtype (bf16 by default), biases / epilogue in f32.
    w0c = w0.astype(compute_dtype)
    w1c = w1.astype(compute_dtype)
    w2c = w2.astype(compute_dtype)
    b0f = b0.astype(jnp.float32)
    b1f = b1.astype(jnp.float32)
    b2f = b2.astype(jnp.float32)

    weight_bytes = (D * H0 + H0 * H1 + H1 * DO) * bytes_per_elem
    bias_bytes = (H0 + H1 + DO) * 4
    est_vmem = (2 * row_tile * D * bytes_per_elem    # double-buffered x tile
                + 2 * row_tile * 4                   # double-buffered out tile
                + weight_bytes + bias_bytes)
    vmem_limit = int(min(64 * 1024 * 1024, max(32 * 1024 * 1024, 2 * est_vmem)))

    cost = pl.CostEstimate(
        flops=2 * N_pad * (D * H0 + H0 * H1 + H1 * DO),
        transcendentals=0,
        bytes_accessed=N_pad * D * bytes_per_elem + N_pad * 4
        + weight_bytes + bias_bytes,
    )

    out_tiles = pl.pallas_call(
        _mlp_kernel,
        out_shape=jax.ShapeDtypeStruct((num_tiles, row_tile), jnp.float32),
        grid=(num_tiles,),
        in_specs=[
            pl.BlockSpec((row_tile, D), lambda i: (i, 0)),   # x row tile
            pl.BlockSpec((D, H0), lambda i: (0, 0)),         # w0 (VMEM resident)
            pl.BlockSpec((1, H0), lambda i: (0, 0)),         # b0
            pl.BlockSpec((H0, H1), lambda i: (0, 0)),        # w1
            pl.BlockSpec((1, H1), lambda i: (0, 0)),         # b1
            pl.BlockSpec((H1, DO), lambda i: (0, 0)),        # w2
            pl.BlockSpec((1, DO), lambda i: (0, 0)),         # b2
        ],
        out_specs=pl.BlockSpec((1, row_tile), lambda i: (i, 0)),  # lane-dense
        compiler_params=pltpu.CompilerParams(
            dimension_semantics=("parallel",),
            vmem_limit_bytes=vmem_limit,
        ),
        cost_estimate=cost,
    )(xf, w0c, b0f, w1c, b1f, w2c, b2f)

    # Strip row padding; x.view(x.shape[0], x.shape[1]) in PyTorch: (B,S,1)->(B,S)
    return out_tiles.reshape(N_pad)[:N].reshape(B, S)


def init_qnetwork_params(key, dim_in, dim_hiddens=(64, 32), dim_out=1):
    """Deterministic init mirroring the PyTorch module.

    dense{i}: Xavier-normal weights (gain=sqrt(2), the 'relu' gain), zero bias.
    out:      PyTorch default Linear init (uniform +/- 1/sqrt(fan_in)).
    Weights are stored transposed as (in_features, out_features) for the kernel.
    """
    dims = (dim_in,) + tuple(dim_hiddens)
    params = []
    gain = jnp.sqrt(2.0)  # nn.init.calculate_gain('relu')
    for i in range(len(dims) - 1):
        fan_in, fan_out = dims[i], dims[i + 1]
        key, wk = jax.random.split(key)
        std = gain * jnp.sqrt(2.0 / (fan_in + fan_out))
        w = std * jax.random.normal(wk, (fan_in, fan_out), dtype=jnp.float32)
        b = jnp.zeros((1, fan_out), dtype=jnp.float32)
        params.extend([w, b])
    # output layer (default PyTorch Linear init)
    fan_in = dims[-1]
    key, wk, bk = jax.random.split(key, 3)
    bound = 1.0 / jnp.sqrt(float(fan_in))
    w_out = jax.random.uniform(wk, (fan_in, dim_out), dtype=jnp.float32,
                               minval=-bound, maxval=bound)
    b_out = jax.random.uniform(bk, (1, dim_out), dtype=jnp.float32,
                               minval=-bound, maxval=bound)
    params.extend([w_out, b_out])
    return tuple(params)


def qnetwork_reference(x, params):
    """Pure-JAX reference for correctness checking."""
    w0, b0, w1, b1, w2, b2 = params
    h = jnp.maximum(x @ w0 + b0, 0.0)
    h = jnp.maximum(h @ w1 + b1, 0.0)
    o = h @ w2 + b2
    return o.reshape(x.shape[0], x.shape[1])


if __name__ == "__main__":
    key = jax.random.PRNGKey(0)
    key, xkey, pkey = jax.random.split(key, 3)

    B, S, DIM_IN = 2, 8, 32          # x.shape[0], x.shape[1], dim_in
    x = jax.random.normal(xkey, (B, S, DIM_IN), dtype=jnp.float32)

    params = init_qnetwork_params(pkey, DIM_IN, dim_hiddens=(64, 32), dim_out=1)
    ref = qnetwork_reference(x, params)

    # f32 path: bit-level-ish agreement with the reference.
    out_f32 = qnetwork_forward(x, params, compute_dtype=jnp.float32)
    out_f32 = jax.block_until_ready(out_f32)
    assert out_f32.shape == (B, S), f"unexpected output shape {out_f32.shape}"
    assert jnp.allclose(out_f32, ref, atol=1e-5, rtol=1e-5), "f32 mismatch vs reference"

    # Default (bf16-input, f32-accumulate) fast path: loose tolerance vs f32 ref.
    out_bf16 = qnetwork_forward(x, params)  # compute_dtype=jnp.bfloat16
    out_bf16 = jax.block_until_ready(out_bf16)
    assert out_bf16.shape == (B, S), f"unexpected output shape {out_bf16.shape}"
    assert jnp.allclose(out_bf16, ref, atol=5e-2, rtol=5e-2), "bf16 mismatch vs reference"

    print("KERNEL_OK")
</pallas_src>

<mosaic_0001>
module attributes {stable_mosaic.version = 11 : i64} {
  func.func @_mlp_kernel(%arg0: i32, %arg1: memref<128x32xf32, #tpu.memory_space<vmem>>, %arg2: memref<32x64xf32, #tpu.memory_space<vmem>>, %arg3: memref<1x64xf32, #tpu.memory_space<vmem>>, %arg4: memref<64x32xf32, #tpu.memory_space<vmem>>, %arg5: memref<1x32xf32, #tpu.memory_space<vmem>>, %arg6: memref<32x1xf32, #tpu.memory_space<vmem>>, %arg7: memref<1x1xf32, #tpu.memory_space<vmem>>, %arg8: memref<1x128xf32, #tpu.memory_space<vmem>>) attributes {dimension_semantics = [#tpu.dimension_semantics<parallel>], iteration_bounds = array<i64: 1>, scalar_prefetch = 0 : i64, scratch_operands = 0 : i64, tpu.core_type = #tpu.core_type<tc>, window_params = [{transform_indices = @transform_0, window_bounds = array<i64: 128, 32>}, {pipeline_mode = #tpu.pipeline_mode<synchronous>, transform_indices = @transform_1, window_bounds = array<i64: 32, 64>}, {pipeline_mode = #tpu.pipeline_mode<synchronous>, transform_indices = @transform_2, window_bounds = array<i64: 1, 64>}, {pipeline_mode = #tpu.pipeline_mode<synchronous>, transform_indices = @transform_3, window_bounds = array<i64: 64, 32>}, {pipeline_mode = #tpu.pipeline_mode<synchronous>, transform_indices = @transform_4, window_bounds = array<i64: 1, 32>}, {pipeline_mode = #tpu.pipeline_mode<synchronous>, transform_indices = @transform_5, window_bounds = array<i64: 32, 1>}, {pipeline_mode = #tpu.pipeline_mode<synchronous>, transform_indices = @transform_6, window_bounds = array<i64: 1, 1>}, {transform_indices = @transform_7, window_bounds = array<i64: 1, 128>}]} {
    %c0 = arith.constant 0 : index
    %c0_0 = arith.constant 0 : index
    %0 = vector.load %arg1[%c0, %c0_0] : memref<128x32xf32, #tpu.memory_space<vmem>>, vector<128x32xf32>
    %c0_1 = arith.constant 0 : index
    %c0_2 = arith.constant 0 : index
    %1 = vector.load %arg2[%c0_1, %c0_2] : memref<32x64xf32, #tpu.memory_space<vmem>>, vector<32x64xf32>
    %cst = arith.constant dense<0.000000e+00> : vector<128x64xf32>
    %2 = tpu.matmul %0, %1, %cst {dimension_numbers = #tpu.dot_dimension_numbers<[1], [0], [0], [1], [0, 0, 1, 1], [], []>} : vector<128x32xf32>, vector<32x64xf32>, vector<128x64xf32> -> vector<128x64xf32>
    %c0_3 = arith.constant 0 : index
    %c0_4 = arith.constant 0 : index
    %3 = vector.load %arg3[%c0_3, %c0_4] : memref<1x64xf32, #tpu.memory_space<vmem>>, vector<1x64xf32>
    %4 = vector.broadcast %3 : vector<1x64xf32> to vector<128x64xf32>
    %5 = arith.addf %2, %4 : vector<128x64xf32>
    %cst_5 = arith.constant 0.000000e+00 : f32
    %6 = vector.broadcast %cst_5 : f32 to vector<128x64xf32>
    %7 = arith.maximumf %5, %6 : vector<128x64xf32>
    %c0_6 = arith.constant 0 : index
    %c0_7 = arith.constant 0 : index
    %8 = vector.load %arg4[%c0_6, %c0_7] : memref<64x32xf32, #tpu.memory_space<vmem>>, vector<64x32xf32>
    %cst_8 = arith.constant dense<0.000000e+00> : vector<128x32xf32>
    %9 = tpu.matmul %7, %8, %cst_8 {dimension_numbers = #tpu.dot_dimension_numbers<[1], [0], [0], [1], [0, 0, 1, 1], [], []>} : vector<128x64xf32>, vector<64x32xf32>, vector<128x32xf32> -> vector<128x32xf32>
    %c0_9 = arith.constant 0 : index
    %c0_10 = arith.constant 0 : index
    %10 = vector.load %arg5[%c0_9, %c0_10] : memref<1x32xf32, #tpu.memory_space<vmem>>, vector<1x32xf32>
    %11 = vector.broadcast %10 : vector<1x32xf32> to vector<128x32xf32>
    %12 = arith.addf %9, %11 : vector<128x32xf32>
    %cst_11 = arith.constant 0.000000e+00 : f32
    %13 = vector.broadcast %cst_11 : f32 to vector<128x32xf32>
    %14 = arith.maximumf %12, %13 : vector<128x32xf32>
    %c0_12 = arith.constant 0 : index
    %c0_13 = arith.constant 0 : index
    %15 = vector.load %arg6[%c0_12, %c0_13] : memref<32x1xf32, #tpu.memory_space<vmem>>, vector<32x1xf32>
    %cst_14 = arith.constant dense<0.000000e+00> : vector<128x1xf32>
    %16 = tpu.matmul %14, %15, %cst_14 {dimension_numbers = #tpu.dot_dimension_numbers<[1], [0], [0], [1], [0, 0, 1, 1], [], []>} : vector<128x32xf32>, vector<32x1xf32>, vector<128x1xf32> -> vector<128x1xf32>
    %c0_15 = arith.constant 0 : index
    %c0_16 = arith.constant 0 : index
    %17 = vector.load %arg7[%c0_15, %c0_16] : memref<1x1xf32, #tpu.memory_space<vmem>>, vector<1x1xf32>
    %18 = vector.broadcast %17 : vector<1x1xf32> to vector<128x1xf32>
    %19 = arith.addf %16, %18 : vector<128x1xf32>
    %20 = vector.shape_cast %19 : vector<128x1xf32> to vector<1x128xf32>
    %c0_17 = arith.constant 0 : index
    %c0_18 = arith.constant 0 : index
    %21 = vector.load %arg8[%c0_17, %c0_18] : memref<1x128xf32, #tpu.memory_space<vmem>>, vector<1x128xf32>
    tpu.vector_store %arg8[%c0_17, %c0_18], %20 {strides = array<i32>} : memref<1x128xf32, #tpu.memory_space<vmem>>, vector<1x128xf32>,
    return
  }
  func.func @transform_0(%arg0: i32) -> (i32, i32) {
    %c0_i32 = arith.constant 0 : i32
    %c0_i32_0 = arith.constant 0 : i32
    return %arg0, %c0_i32 : i32, i32
  }
  func.func @transform_1(%arg0: i32) -> (i32, i32) {
    %c0_i32 = arith.constant 0 : i32
    %c0_i32_0 = arith.constant 0 : i32
    %c0_i32_1 = arith.constant 0 : i32
    return %c0_i32, %c0_i32_0 : i32, i32
  }
  func.func @transform_2(%arg0: i32) -> (i32, i32) {
    %c0_i32 = arith.constant 0 : i32
    %c0_i32_0 = arith.constant 0 : i32
    %c0_i32_1 = arith.constant 0 : i32
    return %c0_i32, %c0_i32_0 : i32, i32
  }
  func.func @transform_3(%arg0: i32) -> (i32, i32) {
    %c0_i32 = arith.constant 0 : i32
    %c0_i32_0 = arith.constant 0 : i32
    %c0_i32_1 = arith.constant 0 : i32
    return %c0_i32, %c0_i32_0 : i32, i32
  }
  func.func @transform_4(%arg0: i32) -> (i32, i32) {
    %c0_i32 = arith.constant 0 : i32
    %c0_i32_0 = arith.constant 0 : i32
    %c0_i32_1 = arith.constant 0 : i32
    return %c0_i32, %c0_i32_0 : i32, i32
  }
  func.func @transform_5(%arg0: i32) -> (i32, i32) {
    %c0_i32 = arith.constant 0 : i32
    %c0_i32_0 = arith.constant 0 : i32
    %c0_i32_1 = arith.constant 0 : i32
    return %c0_i32, %c0_i32_0 : i32, i32
  }
  func.func @transform_6(%arg0: i32) -> (i32, i32) {
    %c0_i32 = arith.constant 0 : i32
    %c0_i32_0 = arith.constant 0 : i32
    %c0_i32_1 = arith.constant 0 : i32
    return %c0_i32, %c0_i32_0 : i32, i32
  }
  func.func @transform_7(%arg0: i32) -> (i32, i32) {
    %c0_i32 = arith.constant 0 : i32
    %c0_i32_0 = arith.constant 0 : i32
    return %arg0, %c0_i32 : i32, i32
  }
}

</mosaic_0001>

<bundles_post_ra>
// kernel: tpu_custom_call.1
= control target key start
LH: loop header
LB: loop body
LE: loop exit
PB: predicated region body
PF: predicated region fallthrough
CT: control target
= control target key end

     0   :  { %s1373_s0 = inlined_call_operand.vmem [shape: f32[128,32], index: 0, kind: input, shape index: {}]   ;;  %s1374_s1 = inlined_call_operand.vmem [shape: f32[32,64], index: 1, kind: input, shape index: {}]   ;;  %s1375_s2 = inlined_call_operand.vmem [shape: f32[1,64], index: 2, kind: input, shape index: {}]   ;;  %s1376_s3 = inlined_call_operand.vmem [shape: f32[64,32], index: 3, kind: input, shape index: {}]   ;;  %s1377_s4 = inlined_call_operand.vmem [shape: f32[1,32], index: 4, kind: input, shape index: {}]   ;;  %s1378_s5 = inlined_call_operand.vmem [shape: f32[32,1], index: 5, kind: input, shape index: {}]   ;;  %s1379_s6 = inlined_call_operand.<no memory space> [shape: f32[1,1], index: 6, kind: input, shape index: {}]   ;;  %s1380_s7 = inlined_call_operand.hbm [shape: f32[1,128], index: 7, kind: output, shape index: {}]  }
   0x1   :  { %v12_v0 = vstv %s1379_s6 }
   0x2   :  { %13 = vst [vmem:[#allocation2] sm:$0x1] %v12_v0 }
   0x3   :  { %v48_v1 = vld [vmem:[%s1374_s1 + $0x18] sm:$0xff]  ;;  %v47_v2 = vld [vmem:[%s1374_s1 + $0x10] sm:$0xff]  ;;  %vm56_vm0 = vcmask 261120   ;;  %v29_v3 = vld [vmem:[%s1373_s0] sm:$0xff] }
   0x4   :  { %1001 = vmatprep.subr.mxu0 %v48_v1  ;;  %1105 = vmatprep.subr.mxu1 %v48_v1  ;;  %v46_v4 = vld [vmem:[%s1374_s1 + $0x8] sm:$0xff]  ;;  %v45_v5 = vld [vmem:[%s1374_s1] sm:$0xff]  ;;  %v31_v7 = vld [vmem:[%s1373_s0 + $0x10] sm:$0xff] }
   0x5   :  { %1002 = vmatpush3.msra.mxu0 %v48_v1  ;;  %1009 = vmatprep.mubr.msk.f32.mxu0 %vm56_vm0, %v29_v3  ;;  %v30_v6 = vld [vmem:[%s1373_s0 + $0x8] sm:$0xff]  ;;  %v37_v8 = vld [vmem:[%s1373_s0 + $0x40] sm:$0xff]  ;;  %v273_v10 = vld [vmem:[%s1376_s3 + $0x38] sm:$0xff] }
   0x6   :  { %1003 = vmatprep.subr.mxu0 %v47_v2  ;;  %1109 = vmatpush3.msra.mxu1 %v48_v1  ;;  %v38_v9 = vld [vmem:[%s1373_s0 + $0x48] sm:$0xff] }
   0x7   :  { %1004 = vmatpush3.msra.mxu0 %v47_v2  ;;  %1106 = vmatprep.subr.mxu1 %v47_v2 }
   0x8   :  { %1005 = vmatprep.subr.mxu0 %v46_v4  ;;  %1110 = vmatpush3.msra.mxu1 %v47_v2 }
   0x9   :  { %1006 = vmatpush3.msra.mxu0 %v46_v4  ;;  %1107 = vmatprep.subr.mxu1 %v46_v4 }
   0xa   :  { %1007 = vmatprep.subr.mxu0 %v45_v5  ;;  %1111 = vmatpush3.msra.mxu1 %v46_v4 }
   0xb   :  { %1008 = vmatpush3.msra.mxu0 %v45_v5  ;;  %1108 = vmatprep.subr.mxu1 %v45_v5 }
   0xc   :  { %14 = vsyncpa [#allocation4], 0  ;;  %1010 = vmatmul.mubr.msk.f32.vlgmr.msra.gmra.mxu0 %vm56_vm0, %v30_v6  ;;  %1112 = vmatpush3.msra.mxu1 %v45_v5  ;;  %v39_v11 = vld [vmem:[%s1373_s0 + $0x50] sm:$0xff]  ;;  %v32_v12 = vld [vmem:[%s1373_s0 + $0x18] sm:$0xff]  ;;  %vm281_vm1 = vcmask 523264   ;;  %vm770_vm2 = vcmask 130112  }
   0xd   :  { %1012 = vmatprep.mubr.msk.f32.mxu0 %vm56_vm0, %v31_v7  ;;  %1021 = vmatprep.mubr.msk.f32.mxu1 %vm56_vm0, %v37_v8  ;;  %v272_v13 = vld [vmem:[%s1376_s3 + $0x30] sm:$0xff]  ;;  %v33_v14 = vld [vmem:[%s1373_s0 + $0x20] sm:$0xff]  ;;  %v40_v15 = vld [vmem:[%s1373_s0 + $0x58] sm:$0xff]  ;;  %vm777_vm3 = vcmask 195712   ;;  %vm784_vm4 = vcmask 261312   ;;  %vm791_vm5 = vcmask 326912  }
   0xe   :  { %1022 = vmatmul.mubr.msk.f32.vlgmr.msra.gmra.mxu1 %vm56_vm0, %v38_v9  ;;  %1033 = vmatprep.subr.mxu1 %v273_v10  ;;  %v271_v16 = vld [vmem:[%s1376_s3 + $0x28] sm:$0xff]  ;;  %v41_v17 = vld [vmem:[%s1373_s0 + $0x60] sm:$0xff]  ;;  %v35_v20 = vld [vmem:[%s1373_s0 + $0x30] sm:$0xff]  ;;  %vm798_vm6 = vcmask 392512   ;;  %vm805_vm7 = vcmask 458112   ;;  %vm812_vm8 = vcmask 523712  }
   0xf   :  { %1024 = vmatprep.mubr.msk.f32.mxu1 %vm56_vm0, %v39_v11  ;;  %1034 = vmatpush3.msra.mxu1 %v273_v10  ;;  %v34_v18 = vld [vmem:[%s1373_s0 + $0x28] sm:$0xff]  ;;  %v270_v19 = vld [vmem:[%s1376_s3 + $0x20] sm:$0xff]  ;;  %v269_v22 = vld [vmem:[%s1376_s3 + $0x18] sm:$0xff]  ;;  %vm819_vm9 = vcmask 589312   ;;  %vm826_vm10 = vcmask 654912   ;;  %vm833_vm11 = vcmask 720512  }
  0x10   :  { %1013 = vmatmul.mubr.msk.f32.gmra.mxu0 %vm56_vm0, %v32_v12  ;;  %1035 = vmatprep.subr.mxu1 %v272_v13  ;;  %v42_v21 = vld [vmem:[%s1373_s0 + $0x68] sm:$0xff]  ;;  %v43_v23 = vld [vmem:[%s1373_s0 + $0x70] sm:$0xff]  ;;  %v36_v24 = vld [vmem:[%s1373_s0 + $0x38] sm:$0xff]  ;;  %vm840_vm12 = vcmask 786112   ;;  %vm847_vm13 = vcmask 851712   ;;  %vm854_vm14 = vcmask 917312  }
  0x11   :  { %1015 = vmatprep.mubr.msk.f32.mxu0 %vm56_vm0, %v33_v14  ;;  %1036 = vmatpush3.msra.mxu1 %v272_v13  ;;  %v44_v25 = vld [vmem:[%s1373_s0 + $0x78] sm:$0xff]  ;;  %v268_v26 = vld [vmem:[%s1376_s3 + $0x10] sm:$0xff]  ;;  %v267_v27 = vld [vmem:[%s1376_s3 + $0x8] sm:$0xff]  ;;  %vm861_vm15 = vcmask 982912  }
  0x12   :  { %1025 = vmatmul.mubr.msk.f32.gmra.mxu1 %vm56_vm0, %v40_v15  ;;  %1037 = vmatprep.subr.mxu1 %v271_v16  ;;  %v266_v28 = vld [vmem:[%s1376_s3] sm:$0xff]  ;;  %v494_v29 = vld [vmem:[%s1378_s5 + $0x18] sm:$0xff]  ;;  %v493_v30 = vld [vmem:[%s1378_s5 + $0x10] sm:$0xff] }
  0x13   :  { %1027 = vmatprep.mubr.msk.f32.mxu1 %vm56_vm0, %v41_v17  ;;  %1038 = vmatpush3.msra.mxu1 %v271_v16  ;;  %v492_v31 = vld [vmem:[%s1378_s5 + $0x8] sm:$0xff]  ;;  %v886_v32 = vld [vmem:[%s1375_s2] ss:$0 sm:$0xff] }
  0x14   :  { %1016 = vmatmul.mubr.msk.f32.gmra.mxu0 %vm56_vm0, %v34_v18  ;;  %1039 = vmatprep.subr.mxu1 %v270_v19  ;;  %v491_v17 = vld [vmem:[%s1378_s5] sm:$0xff] }
  0x15   :  { %1018 = vmatprep.mubr.msk.f32.mxu0 %vm56_vm0, %v35_v20  ;;  %1040 = vmatpush3.msra.mxu1 %v270_v19  ;;  %v903_v18 = vld [vmem:[%s1377_s4] ss:$0 sm:$0xff]  ;;  %s1140_s4 = smov [#allocation3]  }
  0x16   :  { %1028 = vmatmul.mubr.msk.f32.gmra.mxu1 %vm56_vm0, %v42_v21  ;;  %1041 = vmatprep.subr.mxu1 %v269_v22  ;;  %s878_s5 = sshll.u32 %s1140_s4, 4  ;;  %s879_s5 = int_to_ptr.vmem [resolvable:$true] %s878_s5 }
  0x17   :  { %1030 = vmatprep.mubr.msk.f32.mxu1 %vm56_vm0, %v43_v23  ;;  %1042 = vmatpush3.msra.mxu1 %v269_v22  ;;  %s1117_s17 = scalar_lea.vmem %s879_s5, 16  ;;  %s1121_s1 = scalar_lea.vmem %s879_s5, 32 }
  0x18   :  { %1019 = vmatmul.mubr.msk.f32.gmra.mxu0 %vm56_vm0, %v36_v24  ;;  %1043 = vmatprep.subr.mxu1 %v268_v26  ;;  %p1118_p0 = scmp.ne.s32.totalorder %s879_s5, %s1117_s17  ;;  %p1122_p1 = scmp.lt.s32.totalorder %s879_s5, %s879_s5 }
  0x19   :  { %1044 = vmatpush3.msra.mxu1 %v268_v26  ;;  %1073 = vmatprep.subr.mxu0 %v494_v29  ;;  %p1123_p2 = scmp.lt.s32.totalorder %s1121_s1, %s1117_s17 }
  0x1a   :  { %1031 = vmatmul.mubr.msk.f32.gmra.mxu1 %vm56_vm0, %v44_v25  ;;  %1045 = vmatprep.subr.mxu1 %v267_v27 }
  0x1b   :  { %1046 = vmatpush3.msra.mxu1 %v267_v27  ;;  %1074 = vmatpush3.msra.mxu0 %v494_v29  ;;  %p1124_p3 = por %p1123_p2, %p1122_p1 }
  0x1c   :  { %1047 = vmatprep.subr.mxu1 %v266_v28  ;;  %1075 = vmatprep.subr.mxu0 %v493_v30 }
  0x1d   :  { %1048 = vmatpush3.msra.mxu1 %v266_v28  ;;  %1076 = vmatpush3.msra.mxu0 %v493_v30  ;;  %p1125_p4 = pnand %p1124_p3, %p1118_p0 }
  0x1e   :  { %1077 = vmatprep.subr.mxu0 %v492_v31 }
  0x1f   :  { %1078 = vmatpush3.msra.mxu0 %v492_v31 }
  0x20   :  { %1079 = vmatprep.subr.mxu0 %v491_v17 }
  0x21   :  { %1080 = vmatpush3.msra.mxu0 %v491_v17 }
  0xcc   :  { %v1011_v33 = vpop.f32.mrf.mxu0 }
  0xcd   :  { %v177_v34 = vadd.f32 %v1011_v33, %v886_v32 }
  0xce   :  { %v171_v35 = vpop.f32.mrf.mxu0  ;;  %v1023_v36 = vpop.f32.mrf.mxu1 }
  0xcf   :  { %v172_v37 = vadd.f32 %v886_v32, %v171_v35  ;;  %v251_v41 = vmax.f32 %v177_v34, 0.0  ;;  %v217_v2 = vadd.f32 %v1023_v36, %v886_v32 }
  0xd0   :  { %v1014_v38 = vpop.f32.mrf.mxu0  ;;  %v211_v39 = vpop.f32.mrf.mxu1 }
  0xd1   :  { %v250_v40 = vmax.f32 %v172_v37, 0.0  ;;  %v187_v42 = vadd.f32 %v1014_v38, %v886_v32  ;;  %v212_v56 = vadd.f32 %v886_v32, %v211_v39  ;;  %v259_v6 = vmax.f32 %v217_v2, 0.0 }
  0xd2   :  { %v181_v43 = vpop.f32.mrf.mxu0  ;;  %v1026_v44 = vpop.f32.mrf.mxu1 }
  0xd3   :  { %v182_v45 = vadd.f32 %v886_v32, %v181_v43  ;;  %1049 = vmatprep.mubr.msk.f32.mxu1 %vm281_vm1, %v250_v40  ;;  %v253_v49 = vmax.f32 %v187_v42, 0.0  ;;  %v258_v63 = vmax.f32 %v212_v56, 0.0  ;;  %v227_v7 = vadd.f32 %v1026_v44, %v886_v32 }
  0xd4   :  { %v1017_v46 = vpop.f32.mrf.mxu0  ;;  %1050 = vmatmul.mubr.msk.f32.vlgmr.msra.gmra.mxu1 %vm281_vm1, %v251_v41  ;;  %v221_v47 = vpop.f32.mrf.mxu1 }
  0xd5   :  { %v252_v48 = vmax.f32 %v182_v45, 0.0  ;;  %v197_v50 = vadd.f32 %v1017_v46, %v886_v32  ;;  %v222_v0 = vadd.f32 %v886_v32, %v221_v47  ;;  %v261_v11 = vmax.f32 %v227_v7, 0.0 }
  0xd6   :  { %v191_v51 = vpop.f32.mrf.mxu0  ;;  %v1029_v52 = vpop.f32.mrf.mxu1 }
  0xd7   :  { %v192_v53 = vadd.f32 %v886_v32, %v191_v51  ;;  %1052 = vmatprep.mubr.msk.f32.mxu1 %vm281_vm1, %v252_v48  ;;  %v255_v57 = vmax.f32 %v197_v50, 0.0  ;;  %v260_v4 = vmax.f32 %v222_v0, 0.0  ;;  %v237_v12 = vadd.f32 %v1029_v52, %v886_v32 }
  0xd8   :  { %v1020_v54 = vpop.f32.mrf.mxu0  ;;  %1053 = vmatmul.mubr.msk.f32.gmra.mxu1 %vm281_vm1, %v253_v49  ;;  %v231_v60 = vpop.f32.mrf.mxu1 }
  0xd9   :  { %v254_v55 = vmax.f32 %v192_v53, 0.0  ;;  %v207_v58 = vadd.f32 %v1020_v54, %v886_v32  ;;  %v232_v5 = vadd.f32 %v886_v32, %v231_v60  ;;  %v263_v14 = vmax.f32 %v237_v12, 0.0 }
  0xda   :  { %v201_v59 = vpop.f32.mrf.mxu0  ;;  %v1032_v3 = vpop.f32.mrf.mxu1 }
  0xdb   :  { %v202_v61 = vadd.f32 %v886_v32, %v201_v59  ;;  %1055 = vmatprep.mubr.msk.f32.mxu1 %vm281_vm1, %v254_v55  ;;  %v257_v1 = vmax.f32 %v207_v58, 0.0  ;;  %v262_v9 = vmax.f32 %v232_v5, 0.0  ;;  %v247_v15 = vadd.f32 %v1032_v3, %v886_v32 }
  0xdc   :  { %1056 = vmatmul.mubr.msk.f32.gmra.mxu1 %vm281_vm1, %v255_v57  ;;  %v241_v8 = vpop.f32.mrf.mxu1  ;;  %v1139_v3 = vmov 0  }
  0xdd   :  { %v256_v62 = vmax.f32 %v202_v61, 0.0  ;;  %v242_v10 = vadd.f32 %v886_v32, %v241_v8  ;;  %v265_v16 = vmax.f32 %v247_v15, 0.0  ;;  %1115 = vset.pattern.permute.xlu0 %v1139_v3  ;;  %1116 = vset.pattern.permute.xlu1 %v1139_v3 }
  0xdf   :  { %1058 = vmatprep.mubr.msk.f32.mxu1 %vm281_vm1, %v256_v62  ;;  %v264_v13 = vmax.f32 %v242_v10, 0.0 }
  0xe0   :  { %1059 = vmatmul.mubr.msk.f32.gmra.mxu1 %vm281_vm1, %v257_v1 }
  0xe1   :  { %1061 = vmatprep.mubr.msk.f32.mxu1 %vm281_vm1, %v258_v63 }
  0xe4   :  { %1062 = vmatmul.mubr.msk.f32.gmra.mxu1 %vm281_vm1, %v259_v6 }
  0xe5   :  { %1064 = vmatprep.mubr.msk.f32.mxu1 %vm281_vm1, %v260_v4  ;;  %v920_v4 = vld [vmem:[#allocation2] ss:$0 sm:$0xff] }
  0xe8   :  { %1065 = vmatmul.mubr.msk.f32.gmra.mxu1 %vm281_vm1, %v261_v11 }
  0xe9   :  { %1067 = vmatprep.mubr.msk.f32.mxu1 %vm281_vm1, %v262_v9 }
  0xec   :  { %1068 = vmatmul.mubr.msk.f32.gmra.mxu1 %vm281_vm1, %v263_v14 }
  0xed   :  { %1070 = vmatprep.mubr.msk.f32.mxu1 %vm281_vm1, %v264_v13 }
  0xf0   :  { %1071 = vmatmul.mubr.msk.f32.gmra.mxu1 %vm281_vm1, %v265_v16 }
 0x194   :  { %v1051_v19 = vpop.f32.mrf.mxu1 }
 0x195   :  { %v402_v20 = vadd.f32 %v1051_v19, %v903_v18 }
 0x196   :  { %v396_v21 = vpop.f32.mrf.mxu1 }
 0x197   :  { %v397_v22 = vadd.f32 %v903_v18, %v396_v21  ;;  %v476_v25 = vmax.f32 %v402_v20, 0.0 }
 0x198   :  { %v1054_v23 = vpop.f32.mrf.mxu1 }
 0x199   :  { %v475_v24 = vmax.f32 %v397_v22, 0.0  ;;  %v412_v26 = vadd.f32 %v1054_v23, %v903_v18 }
 0x19a   :  { %v406_v27 = vpop.f32.mrf.mxu1 }
 0x19b   :  { %v407_v28 = vadd.f32 %v903_v18, %v406_v27  ;;  %1081 = vmatprep.mubr.msk.f32.mxu0 %vm56_vm0, %v475_v24  ;;  %v478_v31 = vmax.f32 %v412_v26, 0.0 }
 0x19c   :  { %v1057_v29 = vpop.f32.mrf.mxu1  ;;  %1082 = vmatmul.mubr.msk.f32.vlgmr.msra.gmra.mxu0 %vm56_vm0, %v476_v25 }
 0x19d   :  { %v477_v30 = vmax.f32 %v407_v28, 0.0  ;;  %v422_v32 = vadd.f32 %v1057_v29, %v903_v18 }
 0x19e   :  { %v416_v33 = vpop.f32.mrf.mxu1 }
 0x19f   :  { %v417_v34 = vadd.f32 %v903_v18, %v416_v33  ;;  %1084 = vmatprep.mubr.msk.f32.mxu0 %vm56_vm0, %v477_v30  ;;  %v480_v37 = vmax.f32 %v422_v32, 0.0 }
 0x1a0   :  { %v1060_v35 = vpop.f32.mrf.mxu1  ;;  %1085 = vmatmul.mubr.msk.f32.gmra.mxu0 %vm56_vm0, %v478_v31 }
 0x1a1   :  { %v479_v36 = vmax.f32 %v417_v34, 0.0  ;;  %v432_v38 = vadd.f32 %v1060_v35, %v903_v18 }
 0x1a2   :  { %v426_v39 = vpop.f32.mrf.mxu1 }
 0x1a3   :  { %v427_v40 = vadd.f32 %v903_v18, %v426_v39  ;;  %1087 = vmatprep.mubr.msk.f32.mxu0 %vm56_vm0, %v479_v36  ;;  %v482_v43 = vmax.f32 %v432_v38, 0.0 }
 0x1a4   :  { %v1063_v41 = vpop.f32.mrf.mxu1  ;;  %1088 = vmatmul.mubr.msk.f32.gmra.mxu0 %vm56_vm0, %v480_v37  ;;  %v759_v37 = vlaneseq }
 0x1a5   :  { %v481_v42 = vmax.f32 %v427_v40, 0.0  ;;  %v442_v44 = vadd.f32 %v1063_v41, %v903_v18 }
 0x1a6   :  { %v436_v45 = vpop.f32.mrf.mxu1  ;;  %v1334_v38 = vand.u32 127, %v759_v37  ;;  %v1336_v39 = vshrl.u32 %v759_v37, 7 }
 0x1a7   :  { %v437_v46 = vadd.f32 %v903_v18, %v436_v45  ;;  %1090 = vmatprep.mubr.msk.f32.mxu0 %vm56_vm0, %v481_v42  ;;  %v484_v49 = vmax.f32 %v442_v44, 0.0 }
 0x1a8   :  { %v1066_v47 = vpop.f32.mrf.mxu1  ;;  %1091 = vmatmul.mubr.msk.f32.gmra.mxu0 %vm56_vm0, %v482_v43  ;;  %v765_v40 = vadd.s32 4294967288, %v1334_v38  ;;  %v772_v42 = vadd.s32 4294967280, %v1334_v38  ;;  %v779_v43 = vadd.s32 4294967272, %v1334_v38  ;;  %v763_v44 = vsub.s32 %v1334_v38, %v1336_v39 }
 0x1a9   :  { %v483_v48 = vmax.f32 %v437_v46, 0.0  ;;  %v452_v50 = vadd.f32 %v1066_v47, %v903_v18  ;;  %v786_v45 = vadd.s32 4294967264, %v1334_v38 }
 0x1aa   :  { %v446_v51 = vpop.f32.mrf.mxu1  ;;  %v768_v46 = vsub.s32 %v765_v40, %v1336_v39  ;;  %v863_v40 = vadd.s32 4294967176, %v1334_v38 }
 0x1ab   :  { %v447_v52 = vadd.f32 %v903_v18, %v446_v51  ;;  %1093 = vmatprep.mubr.msk.f32.mxu0 %vm56_vm0, %v483_v48  ;;  %v486_v55 = vmax.f32 %v452_v50, 0.0  ;;  %v793_v50 = vadd.s32 4294967256, %v1334_v38  ;;  %v782_v51 = vsub.s32 %v779_v43, %v1336_v39 }
 0x1ac   :  { %v1069_v53 = vpop.f32.mrf.mxu1  ;;  %1094 = vmatmul.mubr.msk.f32.gmra.mxu0 %vm56_vm0, %v484_v49  ;;  %v775_v49 = vsub.s32 %v772_v42, %v1336_v39 }
 0x1ad   :  { %v485_v54 = vmax.f32 %v447_v52, 0.0  ;;  %v462_v56 = vadd.f32 %v1069_v53, %v903_v18  ;;  %v789_v53 = vsub.s32 %v786_v45, %v1336_v39 }
 0x1ae   :  { %v456_v57 = vpop.f32.mrf.mxu1 }
 0x1af   :  { %v457_v58 = vadd.f32 %v903_v18, %v456_v57  ;;  %1096 = vmatprep.mubr.msk.f32.mxu0 %vm56_vm0, %v485_v54  ;;  %v488_v61 = vmax.f32 %v462_v56, 0.0  ;;  %v800_v54 = vadd.s32 4294967248, %v1334_v38 }
 0x1b0   :  { %v1072_v59 = vpop.f32.mrf.mxu1  ;;  %1097 = vmatmul.mubr.msk.f32.gmra.mxu0 %vm56_vm0, %v486_v55 }
 0x1b1   :  { %v487_v60 = vmax.f32 %v457_v58, 0.0  ;;  %v472_v62 = vadd.f32 %v1072_v59, %v903_v18  ;;  %v796_v58 = vsub.s32 %v793_v50, %v1336_v39  ;;  %v807_v59 = vadd.s32 4294967240, %v1334_v38 }
 0x1b2   :  { %v466_v63 = vpop.f32.mrf.mxu1 }
 0x1b3   :  { %v467_v0 = vadd.f32 %v903_v18, %v466_v63  ;;  %1099 = vmatprep.mubr.msk.f32.mxu0 %vm56_vm0, %v487_v60  ;;  %v490_v2 = vmax.f32 %v472_v62, 0.0 }
 0x1b4   :  { %1100 = vmatmul.mubr.msk.f32.gmra.mxu0 %vm56_vm0, %v488_v61 }
 0x1b5   :  { %v489_v1 = vmax.f32 %v467_v0, 0.0 }
 0x1b7   :  { %1102 = vmatprep.mubr.msk.f32.mxu0 %vm56_vm0, %v489_v1  ;;  %v803_v1 = vsub.s32 %v800_v54, %v1336_v39 }
 0x1b8   :  { %1103 = vmatmul.mubr.msk.f32.gmra.mxu0 %vm56_vm0, %v490_v2  ;;  %v814_v2 = vadd.s32 4294967232, %v1334_v38  ;;  %vm868_vm0 = vcmask 1048512  }
 0x25c   :  { %v1083_v5 = vpop.f32.mrf.mxu0 }
 0x25d   :  { %v622_v6 = vadd.f32 %v1083_v5, %v920_v4 }
 0x25e   :  { %v616_v7 = vpop.f32.mrf.mxu0 }
 0x25f   :  { %715 = vperm.xlu0 %1115, %v622_v6   ;;  %v617_v9 = vadd.f32 %v920_v4, %v616_v7  ;;  %v810_v7 = vsub.s32 %v807_v59, %v1336_v39 }
 0x260   :  { %v1086_v8 = vpop.f32.mrf.mxu0 }
 0x261   :  { %v632_v10 = vadd.f32 %v1086_v8, %v920_v4  ;;  %v821_v8 = vadd.s32 4294967224, %v1334_v38 }
 0x262   :  { %v626_v11 = vpop.f32.mrf.mxu0 }
 0x263   :  { %721 = vperm.xlu1 %1116, %v632_v10   ;;  %712 = vperm.xlu0 %1115, %v617_v9   ;;  %v627_v13 = vadd.f32 %v920_v4, %v626_v11 }
 0x264   :  { %v1089_v12 = vpop.f32.mrf.mxu0 }
 0x265   :  { %v642_v17 = vadd.f32 %v1089_v12, %v920_v4  ;;  %v817_v12 = vsub.s32 %v814_v2, %v1336_v39 }
 0x266   :  { %v636_v14 = vpop.f32.mrf.mxu0 }
 0x267   :  { %v637_v15 = vadd.f32 %v920_v4, %v636_v14  ;;  %718 = vperm.xlu1 %1116, %v627_v13   ;;  %v828_v13 = vadd.s32 4294967216, %v1334_v38 }
 0x268   :  { %v1092_v16 = vpop.f32.mrf.mxu0 }
 0x269   :  { %724 = vperm.xlu0 %1115, %v637_v15   ;;  %v652_v21 = vadd.f32 %v1092_v16, %v920_v4 }
 0x26a   :  { %v646_v18 = vpop.f32.mrf.mxu0 }
 0x26b   :  { %v647_v19 = vadd.f32 %v920_v4, %v646_v18  ;;  %727 = vperm.xlu1 %1116, %v642_v17   ;;  %v824_v17 = vsub.s32 %v821_v8, %v1336_v39  ;;  %v835_v18 = vadd.s32 4294967208, %v1334_v38 }
 0x26c   :  { %v1095_v20 = vpop.f32.mrf.mxu0 }
 0x26d   :  { %730 = vperm.xlu0 %1115, %v647_v19   ;;  %v662_v25 = vadd.f32 %v1095_v20, %v920_v4 }
 0x26e   :  { %v656_v22 = vpop.f32.mrf.mxu0 }
 0x26f   :  { %v657_v23 = vadd.f32 %v920_v4, %v656_v22  ;;  %733 = vperm.xlu1 %1116, %v652_v21   ;;  %v831_v22 = vsub.s32 %v828_v13, %v1336_v39 }
 0x270   :  { %v1098_v24 = vpop.f32.mrf.mxu0 }
 0x271   :  { %736 = vperm.xlu0 %1115, %v657_v23   ;;  %v672_v29 = vadd.f32 %v1098_v24, %v920_v4  ;;  %v842_v23 = vadd.s32 4294967200, %v1334_v38 }
 0x272   :  { %v666_v26 = vpop.f32.mrf.mxu0 }
 0x273   :  { %v667_v27 = vadd.f32 %v920_v4, %v666_v26  ;;  %739 = vperm.xlu1 %1116, %v662_v25  }
 0x274   :  { %v1101_v28 = vpop.f32.mrf.mxu0 }
 0x275   :  { %742 = vperm.xlu0 %1115, %v667_v27   ;;  %v682_v33 = vadd.f32 %v1101_v28, %v920_v4  ;;  %v838_v27 = vsub.s32 %v835_v18, %v1336_v39  ;;  %v849_v28 = vadd.s32 4294967192, %v1334_v38 }
 0x276   :  { %v676_v30 = vpop.f32.mrf.mxu0 }
 0x277   :  { %v677_v31 = vadd.f32 %v920_v4, %v676_v30  ;;  %745 = vperm.xlu1 %1116, %v672_v29   ;;  %v852_v37 = vsub.s32 %v849_v28, %v1336_v39 }
 0x278   :  { %v1104_v32 = vpop.f32.mrf.mxu0 }
 0x279   :  { %748 = vperm.xlu0 %1115, %v677_v31   ;;  %v692_v36 = vadd.f32 %v1104_v32, %v920_v4  ;;  %v845_v32 = vsub.s32 %v842_v23, %v1336_v39 }
 0x27a   :  { %v686_v34 = vpop.f32.mrf.mxu0 }
 0x27b   :  { %v687_v35 = vadd.f32 %v920_v4, %v686_v34  ;;  %751 = vperm.xlu1 %1116, %v682_v33   ;;  %v856_v33 = vadd.s32 4294967184, %v1334_v38 }
 0x27d   :  { %754 = vperm.xlu0 %1115, %v687_v35  }
 0x27f   :  { %757 = vperm.xlu1 %1116, %v692_v36  }
 0x2da   :  { %v716_v41 = vpop.permute.xlu0 %715 }
 0x2db   :  { %v769_v55 = vrot.slane %v716_v41, %v768_v46 }
 0x2de   :  { %v722_v47 = vpop.permute.xlu1 %721  ;;  %v713_v48 = vpop.permute.xlu0 %712 }
 0x2df   :  { %v764_v52 = vrot.slane %v713_v48, %v763_v44  ;;  %v783_v60 = vrot.slane %v722_v47, %v782_v51  ;;  %v859_v44 = vsub.s32 %v856_v33, %v1336_v39  ;;  %v866_v48 = vsub.s32 %v863_v40, %v1336_v39 }
 0x2e1   :  { %v771_v61 = vsel %vm770_vm2, %v769_v55, %v764_v52 }
 0x2e2   :  { %v719_v56 = vpop.permute.xlu1 %718 }
 0x2e3   :  { %v776_v57 = vrot.slane %v719_v56, %v775_v49 }
 0x2e4   :  { %v725_v62 = vpop.permute.xlu0 %724 }
 0x2e5   :  { %v778_v63 = vsel %vm777_vm3, %v776_v57, %v771_v61  ;;  %v790_v0 = vrot.slane %v725_v62, %v789_v53 }
 0x2e6   :  { %v785_v3 = vsel %vm784_vm4, %v783_v60, %v778_v63  ;;  %v728_v4 = vpop.permute.xlu1 %727 }
 0x2e7   :  { %v792_v5 = vsel %vm791_vm5, %v790_v0, %v785_v3  ;;  %v797_v6 = vrot.slane %v728_v4, %v796_v58 }
 0x2e8   :  { %v731_v9 = vpop.permute.xlu0 %730 }
 0x2e9   :  { %v799_v10 = vsel %vm798_vm6, %v797_v6, %v792_v5  ;;  %v804_v11 = vrot.slane %v731_v9, %v803_v1 }
 0x2ea   :  { %v734_v14 = vpop.permute.xlu1 %733 }
 0x2eb   :  { %v806_v15 = vsel %vm805_vm7, %v804_v11, %v799_v10  ;;  %v811_v16 = vrot.slane %v734_v14, %v810_v7 }
 0x2ec   :  { %v737_v19 = vpop.permute.xlu0 %736 }
 0x2ed   :  { %v813_v20 = vsel %vm812_vm8, %v811_v16, %v806_v15  ;;  %v818_v21 = vrot.slane %v737_v19, %v817_v12 }
 0x2ee   :  { %v740_v24 = vpop.permute.xlu1 %739 }
 0x2ef   :  { %v820_v25 = vsel %vm819_vm9, %v818_v21, %v813_v20  ;;  %v825_v26 = vrot.slane %v740_v24, %v824_v17 }
 0x2f0   :  { %v743_v29 = vpop.permute.xlu0 %742 }
 0x2f1   :  { %v827_v30 = vsel %vm826_vm10, %v825_v26, %v820_v25  ;;  %v832_v31 = vrot.slane %v743_v29, %v831_v22 }
 0x2f2   :  { %v746_v34 = vpop.permute.xlu1 %745 }
 0x2f3   :  { %v834_v35 = vsel %vm833_vm11, %v832_v31, %v827_v30  ;;  %v839_v36 = vrot.slane %v746_v34, %v838_v27 }
 0x2f4   :  { %v749_v41 = vpop.permute.xlu0 %748 }
 0x2f5   :  { %v841_v42 = vsel %vm840_vm12, %v839_v36, %v834_v35  ;;  %v846_v43 = vrot.slane %v749_v41, %v845_v32 }
 0x2f6   :  { %v752_v45 = vpop.permute.xlu1 %751 }
 0x2f7   :  { %v848_v46 = vsel %vm847_vm13, %v846_v43, %v841_v42  ;;  %v853_v47 = vrot.slane %v752_v45, %v852_v37 }
 0x2f8   :  { %v755_v49 = vpop.permute.xlu0 %754 }
 0x2f9   :  { %v855_v50 = vsel %vm854_vm14, %v853_v47, %v848_v46  ;;  %v860_v51 = vrot.slane %v755_v49, %v859_v44 }
 0x2fa   :  { %v758_v52 = vpop.permute.xlu1 %757 }
 0x2fb   :  { %v867_v38 = vrot.slane %v758_v52, %v866_v48  ;;  %v862_v53 = vsel %vm861_vm15, %v860_v51, %v855_v50 }
 0x2fd   :  { %v869_v54 = vsel %vm868_vm0, %v867_v38, %v862_v53 }
 0x2fe   :  { %871 = vst [vmem:[#allocation3] sm:$0x1] %v869_v54 }
 0x2ff   :  { %1128 = shalt.err (!%p1125_p4)
}
 0x300   :  { %881 = dma.vmem_to_hbm [thread:$0]  %s879_s5, 16, %s1380_s7, [#allocation4]  }
 0x301   :  { %1137 = dma.done.wait [#allocation4], 16  }
 0x302   :  { %1138 = vsyncadd [#allocation4], 4294967280 }
 0x303   :  { %885 = vsyncpa [#allocation4], 1 }

</bundles_post_ra>
